<compile_context>
chip_gen: v6e
topology: v6e:2x2x1
jax: 0.10.0
libtpu: 0.0.40
codegen_flags: <defaults>
</compile_context>

<pallas_src>
import functools
import math

import jax
import jax.numpy as jnp
from jax.experimental import pallas as pl
from jax.experimental.pallas import tpu as pltpu


def _gcn_kernel(x_ref, adj_ref, w_ref, b_ref, o_ref, acc_ref, *,
                compute_dtype, out_transposed):
    """One (batch-tile, contraction-tile) grid step.

    x_ref:   (Bt, Tj, F_in)   node-feature rows of the j-th contraction tile
    adj_ref: (Bt, S,  Tj)     adjacency columns of the j-th contraction tile
    w_ref:   (F_in, F_pad)    weight, already cast to compute_dtype in the wrapper
    b_ref:   (1, F_pad)       bias (f32)
    o_ref:   (Bt, F_pad, S) if out_transposed else (Bt, S, F_pad)
    acc_ref: (Bt, S, F_pad)   f32 accumulator, resident across the j grid axis
    """
    j = pl.program_id(1)

    @pl.when(j == 0)
    def _init():
        acc_ref[...] = jnp.zeros_like(acc_ref)

    bt, tj, f_in = x_ref.shape
    f_pad = w_ref.shape[-1]

    w = w_ref[...]                                              # already compute_dtype
    x = x_ref[...].reshape(bt * tj, f_in).astype(compute_dtype)  # leading-dim merge
    adj = adj_ref[...].astype(compute_dtype)

    # support_j = x_j @ W : one 2-D MXU matmul over all Bt*Tj rows, f32 accumulation.
    support = jnp.dot(x, w, preferred_element_type=jnp.float32)
    support = support.reshape(bt, tj, f_pad).astype(compute_dtype)

    # acc += adj[:, :, j-tile] @ support_j : full-width batched MXU matmul.
    acc_ref[...] += jnp.einsum("bij,bjo->bio", adj, support,
                               preferred_element_type=jnp.float32)

    @pl.when(j == pl.num_programs(1) - 1)
    def _finalize():
        bias = b_ref[...].astype(jnp.float32)                   # (1, F_pad)
        if out_transposed:
            # Emit the torch (F_pad, S) layout straight from VMEM: one XLU transpose
            # per output tile instead of an extra HBM transpose pass in XLA.
            for ib in range(bt):                                # static unroll over batch tile
                o_ref[ib] = (acc_ref[ib] + bias).T.astype(o_ref.dtype)
        else:
            o_ref[...] = (acc_ref[...] + bias).astype(o_ref.dtype)


def _vmem_limits():
    """Per-generation scoped-VMEM limit and tile budget (bytes)."""
    try:
        cap = int(pltpu.get_tpu_info().vmem_capacity_bytes)
    except Exception:                                    # best-effort HW query
        cap = 64 * 1024 * 1024                           # conservative (v7x-sized) fallback
    limit = min((cap * 3) // 4, 96 * 1024 * 1024)        # ~48 MiB on v7x, ~96 MiB on v5e/v6e
    return limit, int(limit * 0.85)                      # leave compiler headroom


def _tile_bytes(block_b, block_j, s, f_in, f_pad, x_item, adj_item, out_item, w_item):
    """Conservative VMEM footprint estimate for a (block_b, block_j) tiling."""
    n = 2 * block_b * block_j * f_in * x_item            # x tiles (double-buffered)
    n += 2 * block_b * s * block_j * adj_item            # adjacency tiles (double-buffered)
    n += 2 * block_b * s * f_pad * out_item              # output tiles (double-buffered)
    n += 2 * (f_in * f_pad * w_item + f_pad * 4)         # weight + bias (conservatively x2)
    n += block_b * s * f_pad * 4                         # f32 accumulator scratch
    n += block_b * s * f_pad * 4                         # f32 einsum partial before +=
    n += 3 * block_b * block_j * f_pad * 4               # support f32 + compute-dtype copy + slack
    n += 2 * block_b * block_j * f_in * 4                # x reshape / cast temporaries
    return n


def _choose_tiling(b, s, budget, bytes_fn, block_b=None, block_j=None):
    """Largest tiles that fit the VMEM budget; prefer an un-tiled contraction and
    keep >= 2 batch grid steps when it costs nothing (v7x megacore split)."""
    b_cands = [block_b] if block_b is not None else [d for d in range(b, 0, -1) if b % d == 0]
    if block_j is not None:
        j_cands = [block_j]
    else:
        j_divs = [d for d in range(128, s, 128) if s % d == 0]   # 128-aligned divisors of S
        j_cands = [s] + sorted(j_divs, reverse=True)
    for tj in j_cands:
        fitting = [bb for bb in b_cands if bytes_fn(bb, tj) <= budget]
        if not fitting:
            continue
        multi = [bb for bb in fitting if b // bb >= 2]
        return (multi[0] if multi else fitting[0]), tj
    # Nothing fits: fall back to the smallest footprint and let the compiler try.
    # TODO(synk): also tile the output rows (i) for graphs too large even at block_b=1, block_j=128.
    return b_cands[-1], j_cands[-1]


def graph_convolution_forward(x, edge, weight, bias=None, *,
                              block_b=None, block_j=None,
                              compute_dtype=jnp.bfloat16):
    """x: (B, S, F_in) or (B, F_in, S), edge: (B, S, S), weight: (F_in, F_out), bias: (F_out,).

    Returns the PyTorch-layout result: squeeze of (B, F_out, S).
    compute_dtype=bf16 runs the MXU in bf16 with f32 accumulation (looser accuracy);
    use jnp.float32 when bit-tight results are needed."""
    f_in, f_out = weight.shape
    # Mirrors the torch orientation fix-up (ambiguous when F_in == S, same as torch).
    if x.shape[-1] != f_in:
        x = jnp.swapaxes(x, -2, -1)
    b, s, _ = x.shape
    assert x.shape[1] == edge.shape[-1], "seq_len mismatch between x and edge"
    assert edge.shape == (b, s, s), "edge must be (batch, seq_len, seq_len)"

    # Lane-aligned graphs get the transposed (B, F_pad, S) result straight from the
    # kernel (stores stay lane-dense); tiny graphs keep (B, S, F_pad) + XLA transpose.
    out_transposed = (s % 128 == 0)

    # F padding: 128 when F is the output's lane dim (unmasked stores); only 8 when F
    # lands on the sublane axis of the transposed output (usually no wrapper slice).
    pad_to = 8 if out_transposed else 128
    f_pad = pad_to * pl.cdiv(f_out, pad_to)
    w_pad = weight if f_pad == f_out else jnp.pad(weight, ((0, 0), (0, f_pad - f_out)))
    w_pad = w_pad.astype(compute_dtype)     # hoisted cast: no per-step VPU cast, half the DMA for bf16

    bias_f32 = (jnp.zeros((f_out,), jnp.float32) if bias is None
                else bias.astype(jnp.float32))
    if f_pad != f_out:
        bias_f32 = jnp.pad(bias_f32, (0, f_pad - f_out))
    b_row = bias_f32.reshape(1, f_pad)

    vmem_limit, budget = _vmem_limits()
    bytes_fn = functools.partial(
        _tile_bytes, s=s, f_in=f_in, f_pad=f_pad,
        x_item=x.dtype.itemsize, adj_item=edge.dtype.itemsize,
        out_item=x.dtype.itemsize, w_item=w_pad.dtype.itemsize)
    block_b, block_j = _choose_tiling(b, s, budget, bytes_fn,
                                      block_b=block_b, block_j=block_j)
    assert b % block_b == 0, "block_b must divide the batch size"
    assert s % block_j == 0, "block_j must divide the sequence length"
    assert block_j == s or block_j % 128 == 0, "contraction tile must be S or a multiple of 128"

    grid = (b // block_b, s // block_j)

    if out_transposed:
        out_struct = jax.ShapeDtypeStruct((b, f_pad, s), x.dtype)
        out_spec = pl.BlockSpec((block_b, f_pad, s), lambda bi, j: (bi, 0, 0))
    else:
        out_struct = jax.ShapeDtypeStruct((b, s, f_pad), x.dtype)
        out_spec = pl.BlockSpec((block_b, s, f_pad), lambda bi, j: (bi, 0, 0))

    kernel = functools.partial(_gcn_kernel, compute_dtype=compute_dtype,
                               out_transposed=out_transposed)

    out = pl.pallas_call(
        kernel,
        out_shape=out_struct,
        grid_spec=pltpu.PrefetchScalarGridSpec(
            num_scalar_prefetch=0,
            grid=grid,
            in_specs=[
                pl.BlockSpec((block_b, block_j, f_in), lambda bi, j: (bi, j, 0)),  # x rows (j-tile)
                pl.BlockSpec((block_b, s, block_j), lambda bi, j: (bi, 0, j)),     # adj cols (j-tile)
                pl.BlockSpec((f_in, f_pad), lambda bi, j: (0, 0)),                 # weight (invariant)
                pl.BlockSpec((1, f_pad), lambda bi, j: (0, 0)),                    # bias   (invariant)
            ],
            out_specs=out_spec,
            scratch_shapes=[pltpu.VMEM((block_b, s, f_pad), jnp.float32)],         # f32 accumulator
        ),
        compiler_params=pltpu.CompilerParams(
            dimension_semantics=("parallel", "arbitrary"),
            vmem_limit_bytes=vmem_limit,
        ),
    )(x, edge, w_pad, b_row)

    if f_pad != f_out:                          # drop feature padding only when F_out is unaligned
        out = out[:, :f_out, :] if out_transposed else out[..., :f_out]
    if not out_transposed:
        out = jnp.swapaxes(out, -2, -1)         # (B, F_out, S) torch layout (small-S path only)
    return jnp.squeeze(out)                     # mirrors torch `.squeeze()`


def _reference(x, edge, weight, bias):
    """Pure-JAX reference mirroring the PyTorch forward semantics."""
    if x.shape[-1] != weight.shape[0]:
        x = jnp.swapaxes(x, -2, -1)
    support = jnp.einsum("bsf,fo->bso", x, weight)
    out = jnp.einsum("bij,bjo->bio", edge, support)        # (B, S, F_out)
    out = jnp.squeeze(jnp.swapaxes(out, -2, -1))           # (B, F_out, S)
    if bias is not None:
        out = out + bias[:, None]
    return out


if __name__ == "__main__":
    key = jax.random.PRNGKey(0)

    def make_case(case_key, batch, seq, f_in, f_out):
        k_x, k_adj, k_w, k_b = jax.random.split(case_key, 4)
        x = jax.random.normal(k_x, (batch, seq, f_in), dtype=jnp.float32)
        raw = jax.random.uniform(k_adj, (batch, seq, seq), dtype=jnp.float32)
        adj = (raw > 0.5).astype(jnp.float32) + jnp.eye(seq, dtype=jnp.float32)[None]
        stdv = 1.0 / math.sqrt(f_out)
        w = jax.random.uniform(k_w, (f_in, f_out), dtype=jnp.float32, minval=-stdv, maxval=stdv)
        bias = jax.random.uniform(k_b, (f_out,), dtype=jnp.float32, minval=-stdv, maxval=stdv)
        return x, adj, w, bias

    keys = jax.random.split(key, 3)

    # Case 1: tiny graph (S % 128 != 0) -> (B, S, F_pad) kernel layout + XLA transpose.
    x, adj, w, bias = make_case(keys[0], 4, 8, 16, 32)
    ref = _reference(x, adj, w, bias)
    out = jax.block_until_ready(
        graph_convolution_forward(x, adj, w, bias, compute_dtype=jnp.float32))
    assert out.shape == (4, 32, 8), out.shape
    assert jnp.allclose(out, ref, atol=1e-4, rtol=1e-4), "case1 f32 kernel mismatch"
    out_bf = jax.block_until_ready(
        graph_convolution_forward(x, adj, w, bias, compute_dtype=jnp.bfloat16))
    assert jnp.allclose(out_bf, ref, atol=5e-2, rtol=5e-2), "case1 bf16 kernel mismatch"

    # Case 2: lane-aligned graph (S = 128) -> transposed (B, F_out, S) output from the kernel.
    x, adj, w, bias = make_case(keys[1], 2, 128, 16, 64)
    ref = _reference(x, adj, w, bias)
    out = jax.block_until_ready(
        graph_convolution_forward(x, adj, w, bias, compute_dtype=jnp.float32))
    assert out.shape == (2, 64, 128), out.shape
    assert jnp.allclose(out, ref, atol=1e-3, rtol=1e-3), "case2 f32 kernel mismatch"

    # Case 3: forced contraction tiling (S = 256, block_j = 128) -> exercises the accumulator path.
    x, adj, w, bias = make_case(keys[2], 2, 256, 16, 32)
    ref = _reference(x, adj, w, bias)
    out = jax.block_until_ready(
        graph_convolution_forward(x, adj, w, bias, block_j=128, compute_dtype=jnp.float32))
    assert out.shape == (2, 32, 256), out.shape
    assert jnp.allclose(out, ref, atol=1e-3, rtol=1e-3), "case3 f32 kernel mismatch"
    out_bf = jax.block_until_ready(
        graph_convolution_forward(x, adj, w, bias, block_j=128, compute_dtype=jnp.bfloat16))
    assert jnp.allclose(out_bf, ref, atol=5e-2, rtol=5e-2), "case3 bf16 kernel mismatch"

    print("KERNEL_OK")
</pallas_src>

<mosaic_0001>
module attributes {stable_mosaic.version = 11 : i64} {
  func.func @_gcn_kernel(%arg0: i32, %arg1: i32, %arg2: memref<2x8x16xf32, #tpu.memory_space<vmem>>, %arg3: memref<2x8x8xf32, #tpu.memory_space<vmem>>, %arg4: memref<16x128xf32, #tpu.memory_space<vmem>>, %arg5: memref<1x128xf32, #tpu.memory_space<vmem>>, %arg6: memref<2x8x128xf32, #tpu.memory_space<vmem>>, %arg7: memref<2x8x128xf32, #tpu.memory_space<vmem>>) attributes {dimension_semantics = [#tpu.dimension_semantics<parallel>, #tpu.dimension_semantics<arbitrary>], iteration_bounds = array<i64: 2, 1>, scalar_prefetch = 0 : i64, scratch_operands = 1 : i64, tpu.core_type = #tpu.core_type<tc>, window_params = [{transform_indices = @transform_0, window_bounds = array<i64: 2, 8, 16>}, {transform_indices = @transform_1, window_bounds = array<i64: 2, 8, 8>}, {pipeline_mode = #tpu.pipeline_mode<synchronous>, transform_indices = @transform_2, window_bounds = array<i64: 16, 128>}, {pipeline_mode = #tpu.pipeline_mode<synchronous>, transform_indices = @transform_3, window_bounds = array<i64: 1, 128>}, {transform_indices = @transform_4, window_bounds = array<i64: 2, 8, 128>}]} {
    %c0_i32 = arith.constant 0 : i32
    %0 = arith.cmpi eq, %arg1, %c0_i32 : i32
    %1 = arith.extui %0 : i1 to i32
    %c0_i32_0 = arith.constant 0 : i32
    %2 = arith.cmpi ne, %1, %c0_i32_0 : i32
    scf.if %2 {
      %cst_17 = arith.constant 0.000000e+00 : f32
      %16 = vector.broadcast %cst_17 : f32 to vector<2x8x128xf32>
      %c0_18 = arith.constant 0 : index
      %c0_19 = arith.constant 0 : index
      %c0_20 = arith.constant 0 : index
      %17 = vector.load %arg7[%c0_18, %c0_19, %c0_20] : memref<2x8x128xf32, #tpu.memory_space<vmem>>, vector<2x8x128xf32>
      tpu.vector_store %arg7[%c0_18, %c0_19, %c0_20], %16 {strides = array<i32>} : memref<2x8x128xf32, #tpu.memory_space<vmem>>, vector<2x8x128xf32>,
    } else {
    }
    %c0 = arith.constant 0 : index
    %c0_1 = arith.constant 0 : index
    %3 = vector.load %arg4[%c0, %c0_1] : memref<16x128xf32, #tpu.memory_space<vmem>>, vector<16x128xf32>
    %c0_2 = arith.constant 0 : index
    %c0_3 = arith.constant 0 : index
    %c0_4 = arith.constant 0 : index
    %4 = vector.load %arg2[%c0_2, %c0_3, %c0_4] : memref<2x8x16xf32, #tpu.memory_space<vmem>>, vector<2x8x16xf32>
    %5 = vector.shape_cast %4 : vector<2x8x16xf32> to vector<16x16xf32>
    %c0_5 = arith.constant 0 : index
    %c0_6 = arith.constant 0 : index
    %c0_7 = arith.constant 0 : index
    %6 = vector.load %arg3[%c0_5, %c0_6, %c0_7] : memref<2x8x8xf32, #tpu.memory_space<vmem>>, vector<2x8x8xf32>
    %cst = arith.constant dense<0.000000e+00> : vector<16x128xf32>
    %7 = tpu.matmul %5, %3, %cst {dimension_numbers = #tpu.dot_dimension_numbers<[1], [0], [0], [1], [0, 0, 1, 1], [], []>} : vector<16x16xf32>, vector<16x128xf32>, vector<16x128xf32> -> vector<16x128xf32>
    %8 = vector.shape_cast %7 : vector<16x128xf32> to vector<2x8x128xf32>
    %c0_8 = arith.constant 0 : index
    %c0_9 = arith.constant 0 : index
    %c0_10 = arith.constant 0 : index
    %9 = vector.load %arg7[%c0_8, %c0_9, %c0_10] : memref<2x8x128xf32, #tpu.memory_space<vmem>>, vector<2x8x128xf32>
    "tpu.trace_start"() <{level = 10 : i32, message = "bij,bjo->bio"}> : () -> ()
    %cst_11 = arith.constant dense<0.000000e+00> : vector<2x8x128xf32>
    %10 = tpu.matmul %6, %8, %cst_11 {dimension_numbers = #tpu.dot_dimension_numbers<[2], [1], [1], [2], [0, 0, 0, 1, 1, 2], [0], [0]>} : vector<2x8x8xf32>, vector<2x8x128xf32>, vector<2x8x128xf32> -> vector<2x8x128xf32>
    "tpu.trace_stop"() : () -> ()
    %11 = arith.addf %9, %10 : vector<2x8x128xf32>
    %c0_12 = arith.constant 0 : index
    %c0_13 = arith.constant 0 : index
    %c0_14 = arith.constant 0 : index
    %12 = vector.load %arg7[%c0_12, %c0_13, %c0_14] : memref<2x8x128xf32, #tpu.memory_space<vmem>>, vector<2x8x128xf32>
    tpu.vector_store %arg7[%c0_12, %c0_13, %c0_14], %11 {strides = array<i32>} : memref<2x8x128xf32, #tpu.memory_space<vmem>>, vector<2x8x128xf32>,
    %c0_i32_15 = arith.constant 0 : i32
    %13 = arith.cmpi eq, %arg1, %c0_i32_15 : i32
    %14 = arith.extui %13 : i1 to i32
    %c0_i32_16 = arith.constant 0 : i32
    %15 = arith.cmpi ne, %14, %c0_i32_16 : i32
    scf.if %15 {
      %c0_17 = arith.constant 0 : index
      %c0_18 = arith.constant 0 : index
      %16 = vector.load %arg5[%c0_17, %c0_18] : memref<1x128xf32, #tpu.memory_space<vmem>>, vector<1x128xf32>
      %c0_19 = arith.constant 0 : index
      %c0_20 = arith.constant 0 : index
      %c0_21 = arith.constant 0 : index
      %17 = vector.load %arg7[%c0_19, %c0_20, %c0_21] : memref<2x8x128xf32, #tpu.memory_space<vmem>>, vector<2x8x128xf32>
      %18 = vector.shape_cast %16 : vector<1x128xf32> to vector<1x1x128xf32>
      %19 = vector.broadcast %18 : vector<1x1x128xf32> to vector<2x8x128xf32>
      %20 = arith.addf %17, %19 : vector<2x8x128xf32>
      %c0_22 = arith.constant 0 : index
      %c0_23 = arith.constant 0 : index
      %c0_24 = arith.constant 0 : index
      %21 = vector.load %arg6[%c0_22, %c0_23, %c0_24] : memref<2x8x128xf32, #tpu.memory_space<vmem>>, vector<2x8x128xf32>
      tpu.vector_store %arg6[%c0_22, %c0_23, %c0_24], %20 {strides = array<i32>} : memref<2x8x128xf32, #tpu.memory_space<vmem>>, vector<2x8x128xf32>,
    } else {
    }
    return
  }
  func.func @transform_0(%arg0: i32, %arg1: i32) -> (i32, i32, i32) {
    %c0_i32 = arith.constant 0 : i32
    %c0_i32_0 = arith.constant 0 : i32
    return %arg0, %arg1, %c0_i32 : i32, i32, i32
  }
  func.func @transform_1(%arg0: i32, %arg1: i32) -> (i32, i32, i32) {
    %c0_i32 = arith.constant 0 : i32
    %c0_i32_0 = arith.constant 0 : i32
    return %arg0, %c0_i32, %arg1 : i32, i32, i32
  }
  func.func @transform_2(%arg0: i32, %arg1: i32) -> (i32, i32) {
    %c0_i32 = arith.constant 0 : i32
    %c0_i32_0 = arith.constant 0 : i32
    %c0_i32_1 = arith.constant 0 : i32
    return %c0_i32, %c0_i32_0 : i32, i32
  }
  func.func @transform_3(%arg0: i32, %arg1: i32) -> (i32, i32) {
    %c0_i32 = arith.constant 0 : i32
    %c0_i32_0 = arith.constant 0 : i32
    %c0_i32_1 = arith.constant 0 : i32
    return %c0_i32, %c0_i32_0 : i32, i32
  }
  func.func @transform_4(%arg0: i32, %arg1: i32) -> (i32, i32, i32) {
    %c0_i32 = arith.constant 0 : i32
    %c0_i32_0 = arith.constant 0 : i32
    %c0_i32_1 = arith.constant 0 : i32
    return %arg0, %c0_i32, %c0_i32_0 : i32, i32, i32
  }
}

</mosaic_0001>

<bundles_post_ra>
// kernel: tpu_custom_call.1
= control target key start
LH: loop header
LB: loop body
LE: loop exit
PB: predicated region body
PF: predicated region fallthrough
CT: control target
= control target key end

     0   :  { %s1244_s0 = inlined_call_operand.hbm [shape: f32[4,8,16], index: 0, kind: input, shape index: {}]   ;;  %s1245_s1 = inlined_call_operand.hbm [shape: f32[4,8,8], index: 1, kind: input, shape index: {}]   ;;  %s1246_s2 = inlined_call_operand.hbm [shape: f32[16,128], index: 2, kind: input, shape index: {}]   ;;  %s1247_s3 = inlined_call_operand.vmem [shape: f32[1,128], index: 3, kind: input, shape index: {}]   ;;  %s1248_s4 = inlined_call_operand.hbm [shape: f32[4,8,128], index: 4, kind: output, shape index: {}]  }
   0x1   :  { %1255 = sst [smem:[#allocation16_spill]] %s1246_s2 }
   0x2   :  { %9 = vsyncpa [#allocation4], 0 }
   0x3   :  { %11 = vsyncpa [#allocation4 + $0x1], 0 }
   0x4   :  { %12 = vsyncpa [#allocation7], 0 }
   0x5   :  { %14 = vsyncpa [#allocation7 + $0x1], 0 }
   0x6   :  { %15 = vsyncpa [#allocation5], 0 }
   0x7   :  { %17 = vsyncpa [#allocation5 + $0x1], 0  ;;  %s1030_s15 = smov 0   ;;  %s1032_s16 = smov 0  }
   0x8   :  { %s1034_s17 = smov 0   ;;  %s1036_s18 = smov 0  }
   0x9   :  { %s1038_s19 = smov 0   ;;  %s1040_s20 = smov 0  }
   0xa LB: > { %1256 = sst [smem:[#allocation14_spill]] %s989_s19  ;;  %s1061_s21 = sadd.s32 4294967295, %s993_s20   ;;  %s993_s20 = sphi %s1040_s20, %s23_s20   ;;  %s989_s19 = sphi %s1038_s19, %s1272_s19   ;;  %s985_s18 = sphi %s1036_s18, %s1271_s18   ;;  %s981_s17 = sphi %s1034_s17, %s1275_s17   ;;  %s977_s16 = sphi %s1032_s16, %s1274_s16   ;;  %s973_s15 = sphi %s1030_s15, %s1273_s15  }
   0xb   : > { %s686_s22 = sadd.s32 4294967294, %s993_s20   ;;  %p57_p0 = scmp.ne.s32.totalorder %s977_s16, %s973_s15 }
   0xc   : > { %p58_p1 = scmp.eq.s32.totalorder %s1061_s21, 0  ;;  %p157_p3 = scmp.eq.s32.totalorder %s686_s22, 1 }
   0xd   : > { %p687_p5 = scmp.ge.s32.totalorder %s993_s20, 1  ;;  %p164_p7 = scmp.lt.s32.totalorder %s993_s20, 3 }
   0xe   : > { %p1070_p4 = por %p58_p1, %p57_p0  ;;  %p1075_p6 = por %p157_p3, %p57_p0 }
   0xf   : > { %p1080_p8 = pnand %p687_p5, %p164_p7  ;;  %s995_s26 = smov [#allocation8]  }
  0x10   : > { %s1258_s24 = scalar_select %p1075_p6, 1, 0 }
  0x11   : > { %s176_s27 = sshll.u32 %s995_s26, 4  ;;  %p749_p9 = pneg %p1080_p8  ;;  %s177_s27 = int_to_ptr.vmem [resolvable:$true] %s176_s27 }
  0x12   : > { %s35_s29 = sadd.s32 1, %s989_s19  ;;  %s834_s30 = scalar_lea.vmem %s177_s27, 256 }
  0x13   : > { %p1089_p11 = pnand %p749_p9, %p58_p1  ;;  %p835_p13 = scmp.ne.s32.totalorder %s177_s27, %s834_s30 }
  0x14   : > { %p842_p5 = scmp.lt.s32.totalorder %s177_s27, %s177_s27  ;;  %p843_p7 = scmp.lt.s32.totalorder %s834_s30, %s834_s30 }
  0x15   : > { %p825_p12 = pneg %p1089_p11 }
  0x16   : > { %p844_p2 = por %p843_p7, %p842_p5 }
  0x17   : > { %p837_p0 = pnand %p835_p13, %p825_p12 }
  0x19   : > { %p838_p3 = pneg %p837_p0 }
  0x1b   : > { %p845_p6 = pnand %p844_p2, %p838_p3 }
  0x1d   : > { %848 = shalt.err (!%p845_p6)
}
  0x1e   : > { %s1249_s5 = smov 128   ;;  %s1251_s6 = smov 8  }
  0x1f   : > { %s1261_s2 = sld [smem:[#allocation16_spill]]  ;;  %p37_p2 = scmp.ge.s32.totalorder %s35_s29, 2 }
  0x20   : > { %s44_s9 = sadd.s32 1, %s981_s17  ;;  %p51_p6 = scmp.ne.s32.totalorder %s981_s17, %s977_s16 }
  0x21   : > { %p52_p9 = scmp.eq.s32.totalorder %s993_s20, 0  ;;  %s1277_s29 = smov (%p37_p2, %s35_s29), 0 }
  0x22   : > { %1262 = sst [smem:[#allocation15_spill]] %s1277_s29  ;;  %p1264_p13 = scmp.eq.s32.totalorder %s1061_s21, 1 }
  0x23   : > { %p1110_p12 = por %p52_p9, %p51_p6  ;;  %s39_s12 = ssub.s32 %s989_s19, %s1277_s29 }
  0x24   : > { %p1116_p0 = por %p1264_p13, %p51_p6  ;;  %p765_p3 = scmp.lt.s32.totalorder %s993_s20, 2 }
  0x25   : > { %752 = dma.hbm_to_vmem [thread:$0]  (!%p1089_p11), %s1261_s2, 256, %s177_s27, [#allocation7], %s1249_s5, %s1249_s5, %s1251_s6  }
  0x26   : > { %p42_p11 = scmp.eq.s32.totalorder %s39_s12, 0  ;;  %s193_s13 = sand.u32 1, %s981_s17  }
  0x27   : > { %s690_s14 = sshll.u32 %s193_s13, 4  ;;  %s711_s26 = sshll.u32 %s989_s19, 8 }
  0x28   : > { %s1125_s22 = scalar_select %p42_p11, %s981_s17, %s44_s9  }
  0x29   : > { %s204_s30 = scalar_lea.hbm %s1244_s0, %s711_s26  ;;  %s197_s7 = scalar_lea.vmem [#allocation3], %s690_s14 }
  0x2a   : > { %s205_s8 = sshll.u32 %s197_s7, 4  ;;  %p1133_p5 = pnand %p765_p3, %p1110_p12  ;;  %s206_s8 = int_to_ptr.vmem [resolvable:$true] %s205_s8 }
  0x2b   : > { %s1140_s9 = scalar_lea.hbm %s1245_s1, %s711_s26  ;;  %s219_s12 = scalar_lea.vmem [#allocation6], %s690_s14 }
  0x2c   : > { %s227_s29 = sshll.u32 %s219_s12, 4  ;;  %s194_s19 = scalar_lea.sflag [#allocation4], %s193_s13  ;;  %s228_s29 = int_to_ptr.vmem [resolvable:$true] %s227_s29 }
  0x2d   : > { %p851_p7 = pneg %p1133_p5  ;;  %s862_s27 = scalar_lea.vmem %s206_s8, 256 }
  0x2e   : > { %p863_p2 = scmp.ne.s32.totalorder %s206_s8, %s862_s27  ;;  %s998_s10 = smov [#allocation3]  }
  0x2f   : > { %s867_s28 = sshll.u32 %s998_s10, 4  ;;  %s868_s28 = int_to_ptr.vmem [resolvable:$false] %s867_s28 }
  0x30   : > { %p865_p6 = pnand %p863_p2, %p851_p7  ;;  %s869_s7 = scalar_lea.vmem %s868_s28, 512 }
  0x31   : > { %p870_p12 = scmp.lt.s32.totalorder %s206_s8, %s868_s28  ;;  %p871_p13 = scmp.lt.s32.totalorder %s869_s7, %s862_s27 }
  0x32   : > { %p866_p9 = pneg %p865_p6 }
  0x33   : > { %p872_p3 = por %p871_p13, %p870_p12 }
  0x35   : > { %p873_p11 = pnand %p872_p3, %p866_p9 }
  0x37   : > { %876 = shalt.err (!%p873_p11)
}
  0x38   : > { %s1267_s2 = smov 8   ;;  %s1268_s6 = smov 128  }
  0x39   : > { %756 = dma.hbm_to_vmem [thread:$0]  (!%p1133_p5), %s204_s30, 256, %s206_s8, %s194_s19, %s1268_s6, %s1268_s6, %s1267_s2  }
  0x3a   : > { %s215_s13 = sand.u32 1, %s993_s20   ;;  %s890_s26 = scalar_lea.vmem %s228_s29, 256 }
  0x3b   : > { %s216_s14 = scalar_lea.sflag [#allocation7], %s215_s13  ;;  %p891_p2 = scmp.ne.s32.totalorder %s228_s29, %s890_s26 }
  0x3c   : > { %s999_s12 = smov [#allocation6]  }
  0x3d   : > { %p893_p6 = pnand %p891_p2, %p851_p7  ;;  %s895_s27 = sshll.u32 %s999_s12, 4  ;;  %s896_s27 = int_to_ptr.vmem [resolvable:$false] %s895_s27 }
  0x3e   : > { %s897_s10 = scalar_lea.vmem %s896_s27, 512  ;;  %p898_p9 = scmp.lt.s32.totalorder %s228_s29, %s896_s27 }
  0x3f   : > { %p894_p10 = pneg %p893_p6  ;;  %p899_p12 = scmp.lt.s32.totalorder %s897_s10, %s890_s26 }
  0x41   : > { %p900_p13 = por %p899_p12, %p898_p9 }
  0x43   : > { %p901_p3 = pnand %p900_p13, %p894_p10 }
  0x45   : > { %904 = shalt.err (!%p901_p3)
}
  0x46   : > { %759 = dma.hbm_to_vmem [thread:$0]  (!%p1133_p5), %s1140_s9, 256, %s228_s29, %s216_s14, %s1268_s6, %s1268_s6, %s1267_s2  }
  0x47   : > { %239 = sbr.rel (%p1080_p8) target bundleno = 496 (0x1f0), region = 36  ;;  %s1165_s19 = sand.u32 (!%p1080_p8), 1, %s977_s16  }
  0x48   : > { %s1168_s30 = sshll.u32 (!%p1080_p8), %s1165_s19, 4  ;;  %s242_s8 = scalar_lea.sflag (!%p1080_p8), [#allocation4], %s1165_s19 }
  0x49   : > { %s245_s28 = scalar_lea.vmem (!%p1080_p8), [#allocation3], %s1168_s30 }
  0x4c   : > { %956 = dma.done.wait (%p1070_p4), %s242_s8, 256  }
  0x4d   : > { %958 = vsyncadd (%p1070_p4), %s242_s8, 4294967040  ;;  %s250_s25 = sand.u32 1, %s1061_s21   ;;  %s254_s5 = scalar_lea.vmem [#allocation6], %s1168_s30 }
  0x4e   : > { %s251_s29 = scalar_lea.sflag [#allocation7], %s250_s25 }
  0x4f   : > { %960 = dma.done.wait (%p1070_p4), %s251_s29, 256  }
  0x50   : > { %962 = vsyncadd (%p1070_p4), %s251_s29, 4294967040 }
  0x51   : > { %964 = dma.done.wait (%p58_p1), [#allocation7], 256  }
  0x52   : > { %966 = vsyncadd (%p58_p1), [#allocation7], 4294967040  ;;  %vm303_vm0 = vcmask 130048   ;;  %v298_v0 = vld [vmem:[#allocation8 + $0x8] sm:$0xff]  ;;  %v297_v1 = vld [vmem:[#allocation8] sm:$0xff]  ;;  %v1000_v4 = vmov 0.0  }
  0x53   : > { %v299_v2 = vld [vmem:[%s245_s28] sm:$0xff]  ;;  %722 = vmatprep.subr.mxu0 %v298_v0  ;;  %v300_v3 = vld [vmem:[%s245_s28 + $0x8] sm:$0xff]  ;;  %729 = vmatprep.subr.mxu1 %v1000_v4  ;;  %vm1001_vm1 = vmmov 0   ;;  %vm387_vm2 = vcmask 64512   ;;  %s287_s9 = scalar_lea.vmem [#allocation9], %s1168_s30  ;;  %s713_s2 = sshll.u32 %s985_s18, 8 }
  0x54   : > { %726 = vmatprep.mubr.msk.f32.mxu0 %vm303_vm0, %v299_v2  ;;  %723 = vmatpush3.msra.mxu0 %v298_v0  ;;  %v301_v6 = vld [vmem:[%s254_s5] sm:$0xff]  ;;  %v302_v8 = vld [vmem:[%s254_s5 + $0x8] sm:$0xff]  ;;  %s568_s7 = sshll.u32 %s287_s9, 4  ;;  %s1196_s14 = scalar_lea.hbm %s1248_s4, %s713_s2  ;;  %s1191_s7 = int_to_ptr.vmem [resolvable:$true] %s568_s7 }
  0x55   : > { %724 = vmatprep.subr.mxu0 %v297_v1  ;;  %731 = vmatprep.mubr.msk.f32.mxu1 %vm1001_vm1, %v1000_v4  ;;  %v705_v9 = vld [vmem:[%s1247_s3] ss:$0 sm:$0xff]  ;;  %s555_s26 = scalar_lea.sflag [#allocation5], %s1165_s19  ;;  %s905_s12 = scalar_lea.vmem %s1191_s7, 256 }
  0x56   : > { %725 = vmatpush3.msra.mxu0 %v297_v1  ;;  %p906_p1 = scmp.ne.s32.totalorder %s1191_s7, %s905_s12  ;;  %s1002_s18 = smov [#allocation9]  }
  0x57   : > { %727 = vmatmul.mubr.msk.f32.vlgmr.msra.gmra.mxu0 %vm303_vm0, %v300_v3  ;;  %s909_s27 = sshll.u32 %s1002_s18, 4  ;;  %s910_s27 = int_to_ptr.vmem [resolvable:$false] %s909_s27 }
  0x58   : > { %p907_p4 = pnand %p906_p1, %p1116_p0  ;;  %s911_s10 = scalar_lea.vmem %s910_s27, 512 }
  0x59   : > { %p912_p10 = scmp.lt.s32.totalorder %s1191_s7, %s910_s27  ;;  %p913_p5 = scmp.lt.s32.totalorder %s911_s10, %s905_s12 }
  0x5a   : > { %p908_p8 = pneg %p907_p4 }
  0x5b   : > { %p914_p7 = por %p913_p5, %p912_p10 }
  0x5d   : > { %p915_p11 = pnand %p914_p7, %p908_p8 }
 0x117   : > { %v728_v5 = vpop.f32.mrf.mxu0 }
 0x119   : > { %v376_v7 = vpop.f32.mrf.mxu0 }
 0x11a   : > { %730 = vmatpush3.msra.mxu1 %v376_v7 }
 0x11b   : > { %732 = vmatmul.mubr.msk.f32.vlgmr.msra.gmra.mxu1 %vm387_vm2, %v301_v6  ;;  %734 = vmatprep.subr.mxu1 %v1000_v4 }
 0x11c   : > { %735 = vmatpush3.msra.mxu1 %v728_v5  ;;  %736 = vmatprep.mubr.msk.f32.mxu1 %vm1001_vm1, %v1000_v4 }
 0x11f   : > { %737 = vmatmul.mubr.msk.f32.vlgmr.msra.gmra.mxu1 %vm387_vm2, %v302_v8 }
 0x1db   : > { %v457_v10 = vpop.f32.mrf.mxu1 }
 0x1dc   : > { %v550_v11 = vadd.f32 %v705_v9, %v457_v10 }
 0x1dd   : > { %v733_v12 = vpop.f32.mrf.mxu1 }
 0x1de   : > { %552 = vst [vmem:[%s287_s9] sm:$0xff] %v550_v11 }
 0x1df   : > { %v530_v13 = vpop.f32.mrf.mxu1 }
 0x1e0   : > { %v551_v14 = vadd.f32 %v705_v9, %v530_v13 }
 0x1e1   : > { %v738_v15 = vpop.f32.mrf.mxu1 }
 0x1e2   : > { %553 = vst [vmem:[%s287_s9 + $0x8] sm:$0xff] %v551_v14 }
 0x1e3   : > { %918 = shalt.err (!%p915_p11)
}
 0x1e4   : > { %s919_s30 = scalar_lea.hbm %s1196_s14, 256  ;;  %s923_s25 = scalar_lea.hbm %s1248_s4, 512 }
 0x1e5   : > { %p920_p2 = scmp.ne.s32.totalorder %s1196_s14, %s919_s30  ;;  %p924_p12 = scmp.lt.s32.totalorder %s1196_s14, %s1248_s4 }
 0x1e6   : > { %p925_p13 = scmp.lt.s32.totalorder %s923_s25, %s919_s30 }
 0x1e7   : > { %p921_p6 = pnand %p920_p2, %p1116_p0 }
 0x1e8   : > { %p926_p3 = por %p925_p13, %p924_p12 }
 0x1e9   : > { %p922_p9 = pneg %p921_p6 }
 0x1eb   : > { %p927_p1 = pnand %p926_p3, %p922_p9 }
 0x1ed   : > { %930 = shalt.err (!%p927_p1)
}
 0x1ee   : > { %s1003_s21 = smov 128   ;;  %s1004_s23 = smov 8  }
 0x1ef   : > { %747 = dma.vmem_to_hbm [thread:$0]  (%p1116_p0), %s1191_s7, 256, %s1196_s14, %s555_s26, %s1003_s21, %s1003_s21, %s1004_s23  }
 0x1f0 PF: > { %s583_s9 = sand.u32 1, %s973_s15   ;;  %p1269_p4 = scmp.ne.s32.totalorder %s1258_s24, 0 }
 0x1f1   : > { %p1270_p8 = scmp.ge.s32.totalorder %s993_s20, 2  ;;  %s584_s2 = scalar_lea.sflag [#allocation5], %s583_s9 }
 0x1f3   : > { %p761_p10 = pnand %p1270_p8, %p1269_p4 }
 0x1f5   : > { %p762_p5 = pneg %p761_p10 }
 0x1f7   : > { %968 = dma.done.wait (%p762_p5), %s584_s2, 256  }
 0x1f8   : > { %970 = vsyncadd (%p762_p5), %s584_s2, 4294967040  ;;  %s23_s20 = sadd.s32 1, %s993_s20   ;;  %s1271_s18 = sld [smem:[#allocation14_spill]] }
 0x1f9   : > { %p20_p7 = scmp.ge.s32.totalorder %s23_s20, 4   ;;  %s1272_s19 = sld [smem:[#allocation15_spill]] }
 0x1fa   : > { %s1273_s15 = smov %s977_s16  ;;  %s1274_s16 = smov %s981_s17 }
 0x1fb   : > { %s1275_s17 = smov %s1125_s22  ;;  %22 = sbr.rel (!%p20_p7) target bundleno = 10 (0xa), region = 106 }
 0x200   :  { %589 = vsyncpa [#allocation4], 1 }
 0x201   :  { %591 = vsyncpa [#allocation4 + $0x1], 1 }
 0x202   :  { %592 = vsyncpa [#allocation7], 1 }
 0x203   :  { %594 = vsyncpa [#allocation7 + $0x1], 1 }
 0x204   :  { %595 = vsyncpa [#allocation5], 1 }
 0x205   :  { %597 = vsyncpa [#allocation5 + $0x1], 1 }

</bundles_post_ra>
